<compile_context>
chip_gen: v7x
topology: tpu7x:2x2x1
jax: 0.10.0
libtpu: 0.0.40
codegen_flags: <defaults>
</compile_context>

<pallas_src>
import functools

import jax
import jax.numpy as jnp
import numpy as np
from jax.experimental import pallas as pl
from jax.experimental.pallas import tpu as pltpu


def _bilinear_matrix(out_size: int, in_size: int) -> np.ndarray:
    """Interpolation matrix M (out_size, in_size) s.t. y = M @ x reproduces
    F.interpolate(mode='bilinear', align_corners=False) along one axis."""
    scale = in_size / out_size
    M = np.zeros((out_size, in_size), dtype=np.float32)
    for i in range(out_size):
        src = (i + 0.5) * scale - 0.5
        src = min(max(src, 0.0), in_size - 1.0)
        i0 = int(np.floor(src))
        i1 = min(i0 + 1, in_size - 1)
        frac = src - i0
        M[i, i0] += 1.0 - frac
        M[i, i1] += frac
    return M


def _disphead4_kernel(x_ref, w_ref, b_ref, uh_ref, uwT_ref, o_ref, zpad_ref,
                      *, C, H, W):
    # x_ref   : (1, C, H, W) VMEM block (one batch element, native NCHW)
    # w_ref   : (C*9,) SMEM, flattened conv11 weight, index = c*9 + ky*3 + kx
    # b_ref   : (1,)   SMEM, conv11 bias
    # uh_ref  : (Ho, H) VMEM  row-interpolation matrix
    # uwT_ref : (W, Wo) VMEM  column-interpolation matrix (pre-transposed)
    # o_ref   : (1, Ho, Wo)
    # zpad_ref: (H+2, W+2) f32 VMEM scratch providing the zero halo
    zpad_ref[...] = jnp.zeros_like(zpad_ref)

    acc = jnp.zeros((H, W), jnp.float32)
    for k in range(9):                       # static unrolled 3x3 taps
        ky, kx = divmod(k, 3)
        # channel-weighted plane for this tap: pure VPU scalar*plane FMAs,
        # scalars streamed from SMEM (no XLU reduction anywhere).
        z = x_ref[0, 0] * w_ref[k]
        for c in range(1, C):
            z = z + x_ref[0, c] * w_ref[c * 9 + k]
        if ky == 1 and kx == 1:
            acc = acc + z                    # center tap: no shift needed
        else:
            zpad_ref[1:H + 1, 1:W + 1] = z   # interior; border stays zero
            acc = acc + zpad_ref[ky:ky + H, kx:kx + W]

    y = jax.nn.sigmoid(acc + b_ref[0])       # (H, W)

    # bilinear upsample as two MXU matmuls:  Uh @ y @ Uw^T (Uw^T precomputed)
    tmp = jnp.dot(y, uwT_ref[...], preferred_element_type=jnp.float32)   # (H, Wo)
    out = jnp.dot(uh_ref[...], tmp, preferred_element_type=jnp.float32)  # (Ho, Wo)
    o_ref[0] = out.astype(o_ref.dtype)


def disphead4_forward(x_nchw, weight, bias, scale: int = 2):
    """x_nchw: (N, C, H, W) float32; weight: (1, C, 3, 3); bias: (1,)
    Returns (N, 1, H*scale, W*scale) — same semantics as DispHead4.forward."""
    N, C, H, W = x_nchw.shape
    # conv11 has a single output channel; fail loudly on anything else.
    assert weight.shape == (1, C, 3, 3), weight.shape
    assert bias.shape == (1,), bias.shape

    if scale > 1:
        Ho, Wo = H * scale, W * scale
        uh = jnp.asarray(_bilinear_matrix(Ho, H))          # (Ho, H)
        uwT = jnp.asarray(_bilinear_matrix(Wo, W).T)       # (W, Wo) pre-transposed
    else:
        Ho, Wo = H, W
        uh = jnp.eye(H, dtype=jnp.float32)
        uwT = jnp.eye(W, dtype=jnp.float32)

    x = x_nchw.astype(jnp.float32)
    # (1, C, 3, 3) -> flat (C*9,), index = c*9 + ky*3 + kx  (SMEM scalars)
    w_flat = weight[0].reshape(C * 9).astype(jnp.float32)
    b = bias.astype(jnp.float32)

    kernel = functools.partial(_disphead4_kernel, C=C, H=H, W=W)

    # Explicit scoped-VMEM budget: input block double-buffered + output +
    # interpolation matrices + halo scratch + live temporaries, 2x headroom.
    elems = (2 * C * H * W + 2 * Ho * Wo + Ho * H + W * Wo
             + (H + 2) * (W + 2) + 6 * H * W + 2 * H * Wo + 2 * Ho * Wo)
    vmem_limit = int(min(100 * 2**20, max(32 * 2**20, 8 * elems)))

    out = pl.pallas_call(
        kernel,
        out_shape=jax.ShapeDtypeStruct((N, Ho, Wo), jnp.float32),
        grid_spec=pltpu.PrefetchScalarGridSpec(
            num_scalar_prefetch=0,
            grid=(N,),
            in_specs=[
                pl.BlockSpec((1, C, H, W), lambda n: (n, 0, 0, 0)),
                pl.BlockSpec(memory_space=pltpu.MemorySpace.SMEM),   # weights
                pl.BlockSpec(memory_space=pltpu.MemorySpace.SMEM),   # bias
                pl.BlockSpec((Ho, H), lambda n: (0, 0)),
                pl.BlockSpec((W, Wo), lambda n: (0, 0)),
            ],
            out_specs=pl.BlockSpec((1, Ho, Wo), lambda n: (n, 0, 0)),
            scratch_shapes=[pltpu.VMEM((H + 2, W + 2), jnp.float32)],
        ),
        compiler_params=pltpu.CompilerParams(
            dimension_semantics=("parallel",),
            vmem_limit_bytes=vmem_limit),
    )(x, w_flat, b, uh, uwT)

    return out.reshape(N, 1, Ho, Wo)


def _reference(x_nchw, weight, bias, scale):
    """Pure-JAX reference for a sanity check."""
    y = jax.lax.conv_general_dilated(
        x_nchw, weight, window_strides=(1, 1), padding="SAME",
        dimension_numbers=("NCHW", "OIHW", "NCHW"))
    y = jax.nn.sigmoid(y + bias.reshape(1, 1, 1, 1))
    if scale > 1:
        _, _, H, W = x_nchw.shape
        uh = jnp.asarray(_bilinear_matrix(H * scale, H))
        uw = jnp.asarray(_bilinear_matrix(W * scale, W))
        y = jnp.einsum("ah,nchw,bw->ncab", uh, y, uw)
    return y


if __name__ == "__main__":
    key = jax.random.PRNGKey(0)
    k1, k2, k3 = jax.random.split(key, 3)

    N, C, H, W = 2, 4, 16, 16           # input_dim = 4 for this synthetic test
    scale = 2

    x = jax.random.normal(k1, (N, C, H, W), dtype=jnp.float32)
    conv11_w = 0.1 * jax.random.normal(k2, (1, C, 3, 3), dtype=jnp.float32)
    conv11_b = 0.1 * jax.random.normal(k3, (1,), dtype=jnp.float32)

    out = disphead4_forward(x, conv11_w, conv11_b, scale=scale)
    out = jax.block_until_ready(out)

    ref = jax.block_until_ready(_reference(x, conv11_w, conv11_b, scale))
    assert out.shape == (N, 1, H * scale, W * scale), out.shape
    np.testing.assert_allclose(np.asarray(out), np.asarray(ref),
                               rtol=1e-5, atol=1e-5)

    print("KERNEL_OK")
</pallas_src>

<mosaic_0001>
module attributes {stable_mosaic.version = 11 : i64} {
  func.func @_disphead4_kernel(%arg0: i32, %arg1: memref<1x4x16x16xf32, #tpu.memory_space<vmem>>, %arg2: memref<36xf32, #tpu.memory_space<smem>>, %arg3: memref<1xf32, #tpu.memory_space<smem>>, %arg4: memref<32x16xf32, #tpu.memory_space<vmem>>, %arg5: memref<16x32xf32, #tpu.memory_space<vmem>>, %arg6: memref<1x32x32xf32, #tpu.memory_space<vmem>>, %arg7: memref<18x18xf32, #tpu.memory_space<vmem>>) attributes {dimension_semantics = [#tpu.dimension_semantics<parallel>], iteration_bounds = array<i64: 2>, scalar_prefetch = 0 : i64, scratch_operands = 1 : i64, tpu.core_type = #tpu.core_type<tc>, window_params = [{transform_indices = @transform_0, window_bounds = array<i64: 1, 4, 16, 16>}, {transform_indices = @transform_1, window_bounds = array<i64: 36>}, {transform_indices = @transform_2, window_bounds = array<i64: 1>}, {pipeline_mode = #tpu.pipeline_mode<synchronous>, transform_indices = @transform_3, window_bounds = array<i64: 32, 16>}, {pipeline_mode = #tpu.pipeline_mode<synchronous>, transform_indices = @transform_4, window_bounds = array<i64: 16, 32>}, {transform_indices = @transform_5, window_bounds = array<i64: 1, 32, 32>}]} {
    %cst = arith.constant 0.000000e+00 : f32
    %0 = vector.broadcast %cst : f32 to vector<18x18xf32>
    %c0 = arith.constant 0 : index
    %c0_0 = arith.constant 0 : index
    %1 = vector.load %arg7[%c0, %c0_0] : memref<18x18xf32, #tpu.memory_space<vmem>>, vector<18x18xf32>
    tpu.vector_store %arg7[%c0, %c0_0], %0 {strides = array<i32>} : memref<18x18xf32, #tpu.memory_space<vmem>>, vector<18x18xf32>,
    %cst_1 = arith.constant 0.000000e+00 : f32
    %2 = vector.broadcast %cst_1 : f32 to vector<16x16xf32>
    %c0_2 = arith.constant 0 : index
    %c0_3 = arith.constant 0 : index
    %c0_4 = arith.constant 0 : index
    %c0_5 = arith.constant 0 : index
    %3 = vector.load %arg1[%c0_2, %c0_3, %c0_4, %c0_5] : memref<1x4x16x16xf32, #tpu.memory_space<vmem>>, vector<1x1x16x16xf32>
    %4 = vector.shape_cast %3 : vector<1x1x16x16xf32> to vector<16x16xf32>
    %c0_6 = arith.constant 0 : index
    %5 = memref.load %arg2[%c0_6] : memref<36xf32, #tpu.memory_space<smem>>
    %6 = vector.broadcast %5 : f32 to vector<16x16xf32>
    %7 = arith.mulf %4, %6 : vector<16x16xf32>
    %c0_7 = arith.constant 0 : index
    %c1 = arith.constant 1 : index
    %c0_8 = arith.constant 0 : index
    %c0_9 = arith.constant 0 : index
    %8 = vector.load %arg1[%c0_7, %c1, %c0_8, %c0_9] : memref<1x4x16x16xf32, #tpu.memory_space<vmem>>, vector<1x1x16x16xf32>
    %9 = vector.shape_cast %8 : vector<1x1x16x16xf32> to vector<16x16xf32>
    %c9 = arith.constant 9 : index
    %10 = memref.load %arg2[%c9] : memref<36xf32, #tpu.memory_space<smem>>
    %11 = vector.broadcast %10 : f32 to vector<16x16xf32>
    %12 = arith.mulf %9, %11 : vector<16x16xf32>
    %13 = arith.addf %7, %12 : vector<16x16xf32>
    %c0_10 = arith.constant 0 : index
    %c2 = arith.constant 2 : index
    %c0_11 = arith.constant 0 : index
    %c0_12 = arith.constant 0 : index
    %14 = vector.load %arg1[%c0_10, %c2, %c0_11, %c0_12] : memref<1x4x16x16xf32, #tpu.memory_space<vmem>>, vector<1x1x16x16xf32>
    %15 = vector.shape_cast %14 : vector<1x1x16x16xf32> to vector<16x16xf32>
    %c18 = arith.constant 18 : index
    %16 = memref.load %arg2[%c18] : memref<36xf32, #tpu.memory_space<smem>>
    %17 = vector.broadcast %16 : f32 to vector<16x16xf32>
    %18 = arith.mulf %15, %17 : vector<16x16xf32>
    %19 = arith.addf %13, %18 : vector<16x16xf32>
    %c0_13 = arith.constant 0 : index
    %c3 = arith.constant 3 : index
    %c0_14 = arith.constant 0 : index
    %c0_15 = arith.constant 0 : index
    %20 = vector.load %arg1[%c0_13, %c3, %c0_14, %c0_15] : memref<1x4x16x16xf32, #tpu.memory_space<vmem>>, vector<1x1x16x16xf32>
    %21 = vector.shape_cast %20 : vector<1x1x16x16xf32> to vector<16x16xf32>
    %c27 = arith.constant 27 : index
    %22 = memref.load %arg2[%c27] : memref<36xf32, #tpu.memory_space<smem>>
    %23 = vector.broadcast %22 : f32 to vector<16x16xf32>
    %24 = arith.mulf %21, %23 : vector<16x16xf32>
    %25 = arith.addf %19, %24 : vector<16x16xf32>
    %c1_16 = arith.constant 1 : index
    %c1_17 = arith.constant 1 : index
    %26 = vector.load %arg7[%c1_16, %c1_17] : memref<18x18xf32, #tpu.memory_space<vmem>>, vector<16x16xf32>
    tpu.vector_store %arg7[%c1_16, %c1_17], %25 {strides = array<i32>} : memref<18x18xf32, #tpu.memory_space<vmem>>, vector<16x16xf32>,
    %c0_18 = arith.constant 0 : index
    %c0_19 = arith.constant 0 : index
    %27 = vector.load %arg7[%c0_18, %c0_19] : memref<18x18xf32, #tpu.memory_space<vmem>>, vector<16x16xf32>
    %28 = arith.addf %2, %27 : vector<16x16xf32>
    %c0_20 = arith.constant 0 : index
    %c0_21 = arith.constant 0 : index
    %c0_22 = arith.constant 0 : index
    %c0_23 = arith.constant 0 : index
    %29 = vector.load %arg1[%c0_20, %c0_21, %c0_22, %c0_23] : memref<1x4x16x16xf32, #tpu.memory_space<vmem>>, vector<1x1x16x16xf32>
    %30 = vector.shape_cast %29 : vector<1x1x16x16xf32> to vector<16x16xf32>
    %c1_24 = arith.constant 1 : index
    %31 = memref.load %arg2[%c1_24] : memref<36xf32, #tpu.memory_space<smem>>
    %32 = vector.broadcast %31 : f32 to vector<16x16xf32>
    %33 = arith.mulf %30, %32 : vector<16x16xf32>
    %c0_25 = arith.constant 0 : index
    %c1_26 = arith.constant 1 : index
    %c0_27 = arith.constant 0 : index
    %c0_28 = arith.constant 0 : index
    %34 = vector.load %arg1[%c0_25, %c1_26, %c0_27, %c0_28] : memref<1x4x16x16xf32, #tpu.memory_space<vmem>>, vector<1x1x16x16xf32>
    %35 = vector.shape_cast %34 : vector<1x1x16x16xf32> to vector<16x16xf32>
    %c10 = arith.constant 10 : index
    %36 = memref.load %arg2[%c10] : memref<36xf32, #tpu.memory_space<smem>>
    %37 = vector.broadcast %36 : f32 to vector<16x16xf32>
    %38 = arith.mulf %35, %37 : vector<16x16xf32>
    %39 = arith.addf %33, %38 : vector<16x16xf32>
    %c0_29 = arith.constant 0 : index
    %c2_30 = arith.constant 2 : index
    %c0_31 = arith.constant 0 : index
    %c0_32 = arith.constant 0 : index
    %40 = vector.load %arg1[%c0_29, %c2_30, %c0_31, %c0_32] : memref<1x4x16x16xf32, #tpu.memory_space<vmem>>, vector<1x1x16x16xf32>
    %41 = vector.shape_cast %40 : vector<1x1x16x16xf32> to vector<16x16xf32>
    %c19 = arith.constant 19 : index
    %42 = memref.load %arg2[%c19] : memref<36xf32, #tpu.memory_space<smem>>
    %43 = vector.broadcast %42 : f32 to vector<16x16xf32>
    %44 = arith.mulf %41, %43 : vector<16x16xf32>
    %45 = arith.addf %39, %44 : vector<16x16xf32>
    %c0_33 = arith.constant 0 : index
    %c3_34 = arith.constant 3 : index
    %c0_35 = arith.constant 0 : index
    %c0_36 = arith.constant 0 : index
    %46 = vector.load %arg1[%c0_33, %c3_34, %c0_35, %c0_36] : memref<1x4x16x16xf32, #tpu.memory_space<vmem>>, vector<1x1x16x16xf32>
    %47 = vector.shape_cast %46 : vector<1x1x16x16xf32> to vector<16x16xf32>
    %c28 = arith.constant 28 : index
    %48 = memref.load %arg2[%c28] : memref<36xf32, #tpu.memory_space<smem>>
    %49 = vector.broadcast %48 : f32 to vector<16x16xf32>
    %50 = arith.mulf %47, %49 : vector<16x16xf32>
    %51 = arith.addf %45, %50 : vector<16x16xf32>
    %c1_37 = arith.constant 1 : index
    %c1_38 = arith.constant 1 : index
    %52 = vector.load %arg7[%c1_37, %c1_38] : memref<18x18xf32, #tpu.memory_space<vmem>>, vector<16x16xf32>
    tpu.vector_store %arg7[%c1_37, %c1_38], %51 {strides = array<i32>} : memref<18x18xf32, #tpu.memory_space<vmem>>, vector<16x16xf32>,
    %c0_39 = arith.constant 0 : index
    %c1_40 = arith.constant 1 : index
    %53 = vector.load %arg7[%c0_39, %c1_40] : memref<18x18xf32, #tpu.memory_space<vmem>>, vector<16x16xf32>
    %54 = arith.addf %28, %53 : vector<16x16xf32>
    %c0_41 = arith.constant 0 : index
    %c0_42 = arith.constant 0 : index
    %c0_43 = arith.constant 0 : index
    %c0_44 = arith.constant 0 : index
    %55 = vector.load %arg1[%c0_41, %c0_42, %c0_43, %c0_44] : memref<1x4x16x16xf32, #tpu.memory_space<vmem>>, vector<1x1x16x16xf32>
    %56 = vector.shape_cast %55 : vector<1x1x16x16xf32> to vector<16x16xf32>
    %c2_45 = arith.constant 2 : index
    %57 = memref.load %arg2[%c2_45] : memref<36xf32, #tpu.memory_space<smem>>
    %58 = vector.broadcast %57 : f32 to vector<16x16xf32>
    %59 = arith.mulf %56, %58 : vector<16x16xf32>
    %c0_46 = arith.constant 0 : index
    %c1_47 = arith.constant 1 : index
    %c0_48 = arith.constant 0 : index
    %c0_49 = arith.constant 0 : index
    %60 = vector.load %arg1[%c0_46, %c1_47, %c0_48, %c0_49] : memref<1x4x16x16xf32, #tpu.memory_space<vmem>>, vector<1x1x16x16xf32>
    %61 = vector.shape_cast %60 : vector<1x1x16x16xf32> to vector<16x16xf32>
    %c11 = arith.constant 11 : index
    %62 = memref.load %arg2[%c11] : memref<36xf32, #tpu.memory_space<smem>>
    %63 = vector.broadcast %62 : f32 to vector<16x16xf32>
    %64 = arith.mulf %61, %63 : vector<16x16xf32>
    %65 = arith.addf %59, %64 : vector<16x16xf32>
    %c0_50 = arith.constant 0 : index
    %c2_51 = arith.constant 2 : index
    %c0_52 = arith.constant 0 : index
    %c0_53 = arith.constant 0 : index
    %66 = vector.load %arg1[%c0_50, %c2_51, %c0_52, %c0_53] : memref<1x4x16x16xf32, #tpu.memory_space<vmem>>, vector<1x1x16x16xf32>
    %67 = vector.shape_cast %66 : vector<1x1x16x16xf32> to vector<16x16xf32>
    %c20 = arith.constant 20 : index
    %68 = memref.load %arg2[%c20] : memref<36xf32, #tpu.memory_space<smem>>
    %69 = vector.broadcast %68 : f32 to vector<16x16xf32>
    %70 = arith.mulf %67, %69 : vector<16x16xf32>
    %71 = arith.addf %65, %70 : vector<16x16xf32>
    %c0_54 = arith.constant 0 : index
    %c3_55 = arith.constant 3 : index
    %c0_56 = arith.constant 0 : index
    %c0_57 = arith.constant 0 : index
    %72 = vector.load %arg1[%c0_54, %c3_55, %c0_56, %c0_57] : memref<1x4x16x16xf32, #tpu.memory_space<vmem>>, vector<1x1x16x16xf32>
    %73 = vector.shape_cast %72 : vector<1x1x16x16xf32> to vector<16x16xf32>
    %c29 = arith.constant 29 : index
    %74 = memref.load %arg2[%c29] : memref<36xf32, #tpu.memory_space<smem>>
    %75 = vector.broadcast %74 : f32 to vector<16x16xf32>
    %76 = arith.mulf %73, %75 : vector<16x16xf32>
    %77 = arith.addf %71, %76 : vector<16x16xf32>
    %c1_58 = arith.constant 1 : index
    %c1_59 = arith.constant 1 : index
    %78 = vector.load %arg7[%c1_58, %c1_59] : memref<18x18xf32, #tpu.memory_space<vmem>>, vector<16x16xf32>
    tpu.vector_store %arg7[%c1_58, %c1_59], %77 {strides = array<i32>} : memref<18x18xf32, #tpu.memory_space<vmem>>, vector<16x16xf32>,
    %c0_60 = arith.constant 0 : index
    %c2_61 = arith.constant 2 : index
    %79 = vector.load %arg7[%c0_60, %c2_61] : memref<18x18xf32, #tpu.memory_space<vmem>>, vector<16x16xf32>
    %80 = arith.addf %54, %79 : vector<16x16xf32>
    %c0_62 = arith.constant 0 : index
    %c0_63 = arith.constant 0 : index
    %c0_64 = arith.constant 0 : index
    %c0_65 = arith.constant 0 : index
    %81 = vector.load %arg1[%c0_62, %c0_63, %c0_64, %c0_65] : memref<1x4x16x16xf32, #tpu.memory_space<vmem>>, vector<1x1x16x16xf32>
    %82 = vector.shape_cast %81 : vector<1x1x16x16xf32> to vector<16x16xf32>
    %c3_66 = arith.constant 3 : index
    %83 = memref.load %arg2[%c3_66] : memref<36xf32, #tpu.memory_space<smem>>
    %84 = vector.broadcast %83 : f32 to vector<16x16xf32>
    %85 = arith.mulf %82, %84 : vector<16x16xf32>
    %c0_67 = arith.constant 0 : index
    %c1_68 = arith.constant 1 : index
    %c0_69 = arith.constant 0 : index
    %c0_70 = arith.constant 0 : index
    %86 = vector.load %arg1[%c0_67, %c1_68, %c0_69, %c0_70] : memref<1x4x16x16xf32, #tpu.memory_space<vmem>>, vector<1x1x16x16xf32>
    %87 = vector.shape_cast %86 : vector<1x1x16x16xf32> to vector<16x16xf32>
    %c12 = arith.constant 12 : index
    %88 = memref.load %arg2[%c12] : memref<36xf32, #tpu.memory_space<smem>>
    %89 = vector.broadcast %88 : f32 to vector<16x16xf32>
    %90 = arith.mulf %87, %89 : vector<16x16xf32>
    %91 = arith.addf %85, %90 : vector<16x16xf32>
    %c0_71 = arith.constant 0 : index
    %c2_72 = arith.constant 2 : index
    %c0_73 = arith.constant 0 : index
    %c0_74 = arith.constant 0 : index
    %92 = vector.load %arg1[%c0_71, %c2_72, %c0_73, %c0_74] : memref<1x4x16x16xf32, #tpu.memory_space<vmem>>, vector<1x1x16x16xf32>
    %93 = vector.shape_cast %92 : vector<1x1x16x16xf32> to vector<16x16xf32>
    %c21 = arith.constant 21 : index
    %94 = memref.load %arg2[%c21] : memref<36xf32, #tpu.memory_space<smem>>
    %95 = vector.broadcast %94 : f32 to vector<16x16xf32>
    %96 = arith.mulf %93, %95 : vector<16x16xf32>
    %97 = arith.addf %91, %96 : vector<16x16xf32>
    %c0_75 = arith.constant 0 : index
    %c3_76 = arith.constant 3 : index
    %c0_77 = arith.constant 0 : index
    %c0_78 = arith.constant 0 : index
    %98 = vector.load %arg1[%c0_75, %c3_76, %c0_77, %c0_78] : memref<1x4x16x16xf32, #tpu.memory_space<vmem>>, vector<1x1x16x16xf32>
    %99 = vector.shape_cast %98 : vector<1x1x16x16xf32> to vector<16x16xf32>
    %c30 = arith.constant 30 : index
    %100 = memref.load %arg2[%c30] : memref<36xf32, #tpu.memory_space<smem>>
    %101 = vector.broadcast %100 : f32 to vector<16x16xf32>
    %102 = arith.mulf %99, %101 : vector<16x16xf32>
    %103 = arith.addf %97, %102 : vector<16x16xf32>
    %c1_79 = arith.constant 1 : index
    %c1_80 = arith.constant 1 : index
    %104 = vector.load %arg7[%c1_79, %c1_80] : memref<18x18xf32, #tpu.memory_space<vmem>>, vector<16x16xf32>
    tpu.vector_store %arg7[%c1_79, %c1_80], %103 {strides = array<i32>} : memref<18x18xf32, #tpu.memory_space<vmem>>, vector<16x16xf32>,
    %c1_81 = arith.constant 1 : index
    %c0_82 = arith.constant 0 : index
    %105 = vector.load %arg7[%c1_81, %c0_82] : memref<18x18xf32, #tpu.memory_space<vmem>>, vector<16x16xf32>
    %106 = arith.addf %80, %105 : vector<16x16xf32>
    %c0_83 = arith.constant 0 : index
    %c0_84 = arith.constant 0 : index
    %c0_85 = arith.constant 0 : index
    %c0_86 = arith.constant 0 : index
    %107 = vector.load %arg1[%c0_83, %c0_84, %c0_85, %c0_86] : memref<1x4x16x16xf32, #tpu.memory_space<vmem>>, vector<1x1x16x16xf32>
    %108 = vector.shape_cast %107 : vector<1x1x16x16xf32> to vector<16x16xf32>
    %c4 = arith.constant 4 : index
    %109 = memref.load %arg2[%c4] : memref<36xf32, #tpu.memory_space<smem>>
    %110 = vector.broadcast %109 : f32 to vector<16x16xf32>
    %111 = arith.mulf %108, %110 : vector<16x16xf32>
    %c0_87 = arith.constant 0 : index
    %c1_88 = arith.constant 1 : index
    %c0_89 = arith.constant 0 : index
    %c0_90 = arith.constant 0 : index
    %112 = vector.load %arg1[%c0_87, %c1_88, %c0_89, %c0_90] : memref<1x4x16x16xf32, #tpu.memory_space<vmem>>, vector<1x1x16x16xf32>
    %113 = vector.shape_cast %112 : vector<1x1x16x16xf32> to vector<16x16xf32>
    %c13 = arith.constant 13 : index
    %114 = memref.load %arg2[%c13] : memref<36xf32, #tpu.memory_space<smem>>
    %115 = vector.broadcast %114 : f32 to vector<16x16xf32>
    %116 = arith.mulf %113, %115 : vector<16x16xf32>
    %117 = arith.addf %111, %116 : vector<16x16xf32>
    %c0_91 = arith.constant 0 : index
    %c2_92 = arith.constant 2 : index
    %c0_93 = arith.constant 0 : index
    %c0_94 = arith.constant 0 : index
    %118 = vector.load %arg1[%c0_91, %c2_92, %c0_93, %c0_94] : memref<1x4x16x16xf32, #tpu.memory_space<vmem>>, vector<1x1x16x16xf32>
    %119 = vector.shape_cast %118 : vector<1x1x16x16xf32> to vector<16x16xf32>
    %c22 = arith.constant 22 : index
    %120 = memref.load %arg2[%c22] : memref<36xf32, #tpu.memory_space<smem>>
    %121 = vector.broadcast %120 : f32 to vector<16x16xf32>
    %122 = arith.mulf %119, %121 : vector<16x16xf32>
    %123 = arith.addf %117, %122 : vector<16x16xf32>
    %c0_95 = arith.constant 0 : index
    %c3_96 = arith.constant 3 : index
    %c0_97 = arith.constant 0 : index
    %c0_98 = arith.constant 0 : index
    %124 = vector.load %arg1[%c0_95, %c3_96, %c0_97, %c0_98] : memref<1x4x16x16xf32, #tpu.memory_space<vmem>>, vector<1x1x16x16xf32>
    %125 = vector.shape_cast %124 : vector<1x1x16x16xf32> to vector<16x16xf32>
    %c31 = arith.constant 31 : index
    %126 = memref.load %arg2[%c31] : memref<36xf32, #tpu.memory_space<smem>>
    %127 = vector.broadcast %126 : f32 to vector<16x16xf32>
    %128 = arith.mulf %125, %127 : vector<16x16xf32>
    %129 = arith.addf %123, %128 : vector<16x16xf32>
    %130 = arith.addf %106, %129 : vector<16x16xf32>
    %c0_99 = arith.constant 0 : index
    %c0_100 = arith.constant 0 : index
    %c0_101 = arith.constant 0 : index
    %c0_102 = arith.constant 0 : index
    %131 = vector.load %arg1[%c0_99, %c0_100, %c0_101, %c0_102] : memref<1x4x16x16xf32, #tpu.memory_space<vmem>>, vector<1x1x16x16xf32>
    %132 = vector.shape_cast %131 : vector<1x1x16x16xf32> to vector<16x16xf32>
    %c5 = arith.constant 5 : index
    %133 = memref.load %arg2[%c5] : memref<36xf32, #tpu.memory_space<smem>>
    %134 = vector.broadcast %133 : f32 to vector<16x16xf32>
    %135 = arith.mulf %132, %134 : vector<16x16xf32>
    %c0_103 = arith.constant 0 : index
    %c1_104 = arith.constant 1 : index
    %c0_105 = arith.constant 0 : index
    %c0_106 = arith.constant 0 : index
    %136 = vector.load %arg1[%c0_103, %c1_104, %c0_105, %c0_106] : memref<1x4x16x16xf32, #tpu.memory_space<vmem>>, vector<1x1x16x16xf32>
    %137 = vector.shape_cast %136 : vector<1x1x16x16xf32> to vector<16x16xf32>
    %c14 = arith.constant 14 : index
    %138 = memref.load %arg2[%c14] : memref<36xf32, #tpu.memory_space<smem>>
    %139 = vector.broadcast %138 : f32 to vector<16x16xf32>
    %140 = arith.mulf %137, %139 : vector<16x16xf32>
    %141 = arith.addf %135, %140 : vector<16x16xf32>
    %c0_107 = arith.constant 0 : index
    %c2_108 = arith.constant 2 : index
    %c0_109 = arith.constant 0 : index
    %c0_110 = arith.constant 0 : index
    %142 = vector.load %arg1[%c0_107, %c2_108, %c0_109, %c0_110] : memref<1x4x16x16xf32, #tpu.memory_space<vmem>>, vector<1x1x16x16xf32>
    %143 = vector.shape_cast %142 : vector<1x1x16x16xf32> to vector<16x16xf32>
    %c23 = arith.constant 23 : index
    %144 = memref.load %arg2[%c23] : memref<36xf32, #tpu.memory_space<smem>>
    %145 = vector.broadcast %144 : f32 to vector<16x16xf32>
    %146 = arith.mulf %143, %145 : vector<16x16xf32>
    %147 = arith.addf %141, %146 : vector<16x16xf32>
    %c0_111 = arith.constant 0 : index
    %c3_112 = arith.constant 3 : index
    %c0_113 = arith.constant 0 : index
    %c0_114 = arith.constant 0 : index
    %148 = vector.load %arg1[%c0_111, %c3_112, %c0_113, %c0_114] : memref<1x4x16x16xf32, #tpu.memory_space<vmem>>, vector<1x1x16x16xf32>
    %149 = vector.shape_cast %148 : vector<1x1x16x16xf32> to vector<16x16xf32>
    %c32 = arith.constant 32 : index
    %150 = memref.load %arg2[%c32] : memref<36xf32, #tpu.memory_space<smem>>
    %151 = vector.broadcast %150 : f32 to vector<16x16xf32>
    %152 = arith.mulf %149, %151 : vector<16x16xf32>
    %153 = arith.addf %147, %152 : vector<16x16xf32>
    %c1_115 = arith.constant 1 : index
    %c1_116 = arith.constant 1 : index
    %154 = vector.load %arg7[%c1_115, %c1_116] : memref<18x18xf32, #tpu.memory_space<vmem>>, vector<16x16xf32>
    tpu.vector_store %arg7[%c1_115, %c1_116], %153 {strides = array<i32>} : memref<18x18xf32, #tpu.memory_space<vmem>>, vector<16x16xf32>,
    %c1_117 = arith.constant 1 : index
    %c2_118 = arith.constant 2 : index
    %155 = vector.load %arg7[%c1_117, %c2_118] : memref<18x18xf32, #tpu.memory_space<vmem>>, vector<16x16xf32>
    %156 = arith.addf %130, %155 : vector<16x16xf32>
    %c0_119 = arith.constant 0 : index
    %c0_120 = arith.constant 0 : index
    %c0_121 = arith.constant 0 : index
    %c0_122 = arith.constant 0 : index
    %157 = vector.load %arg1[%c0_119, %c0_120, %c0_121, %c0_122] : memref<1x4x16x16xf32, #tpu.memory_space<vmem>>, vector<1x1x16x16xf32>
    %158 = vector.shape_cast %157 : vector<1x1x16x16xf32> to vector<16x16xf32>
    %c6 = arith.constant 6 : index
    %159 = memref.load %arg2[%c6] : memref<36xf32, #tpu.memory_space<smem>>
    %160 = vector.broadcast %159 : f32 to vector<16x16xf32>
    %161 = arith.mulf %158, %160 : vector<16x16xf32>
    %c0_123 = arith.constant 0 : index
    %c1_124 = arith.constant 1 : index
    %c0_125 = arith.constant 0 : index
    %c0_126 = arith.constant 0 : index
    %162 = vector.load %arg1[%c0_123, %c1_124, %c0_125, %c0_126] : memref<1x4x16x16xf32, #tpu.memory_space<vmem>>, vector<1x1x16x16xf32>
    %163 = vector.shape_cast %162 : vector<1x1x16x16xf32> to vector<16x16xf32>
    %c15 = arith.constant 15 : index
    %164 = memref.load %arg2[%c15] : memref<36xf32, #tpu.memory_space<smem>>
    %165 = vector.broadcast %164 : f32 to vector<16x16xf32>
    %166 = arith.mulf %163, %165 : vector<16x16xf32>
    %167 = arith.addf %161, %166 : vector<16x16xf32>
    %c0_127 = arith.constant 0 : index
    %c2_128 = arith.constant 2 : index
    %c0_129 = arith.constant 0 : index
    %c0_130 = arith.constant 0 : index
    %168 = vector.load %arg1[%c0_127, %c2_128, %c0_129, %c0_130] : memref<1x4x16x16xf32, #tpu.memory_space<vmem>>, vector<1x1x16x16xf32>
    %169 = vector.shape_cast %168 : vector<1x1x16x16xf32> to vector<16x16xf32>
    %c24 = arith.constant 24 : index
    %170 = memref.load %arg2[%c24] : memref<36xf32, #tpu.memory_space<smem>>
    %171 = vector.broadcast %170 : f32 to vector<16x16xf32>
    %172 = arith.mulf %169, %171 : vector<16x16xf32>
    %173 = arith.addf %167, %172 : vector<16x16xf32>
    %c0_131 = arith.constant 0 : index
    %c3_132 = arith.constant 3 : index
    %c0_133 = arith.constant 0 : index
    %c0_134 = arith.constant 0 : index
    %174 = vector.load %arg1[%c0_131, %c3_132, %c0_133, %c0_134] : memref<1x4x16x16xf32, #tpu.memory_space<vmem>>, vector<1x1x16x16xf32>
    %175 = vector.shape_cast %174 : vector<1x1x16x16xf32> to vector<16x16xf32>
    %c33 = arith.constant 33 : index
    %176 = memref.load %arg2[%c33] : memref<36xf32, #tpu.memory_space<smem>>
    %177 = vector.broadcast %176 : f32 to vector<16x16xf32>
    %178 = arith.mulf %175, %177 : vector<16x16xf32>
    %179 = arith.addf %173, %178 : vector<16x16xf32>
    %c1_135 = arith.constant 1 : index
    %c1_136 = arith.constant 1 : index
    %180 = vector.load %arg7[%c1_135, %c1_136] : memref<18x18xf32, #tpu.memory_space<vmem>>, vector<16x16xf32>
    tpu.vector_store %arg7[%c1_135, %c1_136], %179 {strides = array<i32>} : memref<18x18xf32, #tpu.memory_space<vmem>>, vector<16x16xf32>,
    %c2_137 = arith.constant 2 : index
    %c0_138 = arith.constant 0 : index
    %181 = vector.load %arg7[%c2_137, %c0_138] : memref<18x18xf32, #tpu.memory_space<vmem>>, vector<16x16xf32>
    %182 = arith.addf %156, %181 : vector<16x16xf32>
    %c0_139 = arith.constant 0 : index
    %c0_140 = arith.constant 0 : index
    %c0_141 = arith.constant 0 : index
    %c0_142 = arith.constant 0 : index
    %183 = vector.load %arg1[%c0_139, %c0_140, %c0_141, %c0_142] : memref<1x4x16x16xf32, #tpu.memory_space<vmem>>, vector<1x1x16x16xf32>
    %184 = vector.shape_cast %183 : vector<1x1x16x16xf32> to vector<16x16xf32>
    %c7 = arith.constant 7 : index
    %185 = memref.load %arg2[%c7] : memref<36xf32, #tpu.memory_space<smem>>
    %186 = vector.broadcast %185 : f32 to vector<16x16xf32>
    %187 = arith.mulf %184, %186 : vector<16x16xf32>
    %c0_143 = arith.constant 0 : index
    %c1_144 = arith.constant 1 : index
    %c0_145 = arith.constant 0 : index
    %c0_146 = arith.constant 0 : index
    %188 = vector.load %arg1[%c0_143, %c1_144, %c0_145, %c0_146] : memref<1x4x16x16xf32, #tpu.memory_space<vmem>>, vector<1x1x16x16xf32>
    %189 = vector.shape_cast %188 : vector<1x1x16x16xf32> to vector<16x16xf32>
    %c16 = arith.constant 16 : index
    %190 = memref.load %arg2[%c16] : memref<36xf32, #tpu.memory_space<smem>>
    %191 = vector.broadcast %190 : f32 to vector<16x16xf32>
    %192 = arith.mulf %189, %191 : vector<16x16xf32>
    %193 = arith.addf %187, %192 : vector<16x16xf32>
    %c0_147 = arith.constant 0 : index
    %c2_148 = arith.constant 2 : index
    %c0_149 = arith.constant 0 : index
    %c0_150 = arith.constant 0 : index
    %194 = vector.load %arg1[%c0_147, %c2_148, %c0_149, %c0_150] : memref<1x4x16x16xf32, #tpu.memory_space<vmem>>, vector<1x1x16x16xf32>
    %195 = vector.shape_cast %194 : vector<1x1x16x16xf32> to vector<16x16xf32>
    %c25 = arith.constant 25 : index
    %196 = memref.load %arg2[%c25] : memref<36xf32, #tpu.memory_space<smem>>
    %197 = vector.broadcast %196 : f32 to vector<16x16xf32>
    %198 = arith.mulf %195, %197 : vector<16x16xf32>
    %199 = arith.addf %193, %198 : vector<16x16xf32>
    %c0_151 = arith.constant 0 : index
    %c3_152 = arith.constant 3 : index
    %c0_153 = arith.constant 0 : index
    %c0_154 = arith.constant 0 : index
    %200 = vector.load %arg1[%c0_151, %c3_152, %c0_153, %c0_154] : memref<1x4x16x16xf32, #tpu.memory_space<vmem>>, vector<1x1x16x16xf32>
    %201 = vector.shape_cast %200 : vector<1x1x16x16xf32> to vector<16x16xf32>
    %c34 = arith.constant 34 : index
    %202 = memref.load %arg2[%c34] : memref<36xf32, #tpu.memory_space<smem>>
    %203 = vector.broadcast %202 : f32 to vector<16x16xf32>
    %204 = arith.mulf %201, %203 : vector<16x16xf32>
    %205 = arith.addf %199, %204 : vector<16x16xf32>
    %c1_155 = arith.constant 1 : index
    %c1_156 = arith.constant 1 : index
    %206 = vector.load %arg7[%c1_155, %c1_156] : memref<18x18xf32, #tpu.memory_space<vmem>>, vector<16x16xf32>
    tpu.vector_store %arg7[%c1_155, %c1_156], %205 {strides = array<i32>} : memref<18x18xf32, #tpu.memory_space<vmem>>, vector<16x16xf32>,
    %c2_157 = arith.constant 2 : index
    %c1_158 = arith.constant 1 : index
    %207 = vector.load %arg7[%c2_157, %c1_158] : memref<18x18xf32, #tpu.memory_space<vmem>>, vector<16x16xf32>
    %208 = arith.addf %182, %207 : vector<16x16xf32>
    %c0_159 = arith.constant 0 : index
    %c0_160 = arith.constant 0 : index
    %c0_161 = arith.constant 0 : index
    %c0_162 = arith.constant 0 : index
    %209 = vector.load %arg1[%c0_159, %c0_160, %c0_161, %c0_162] : memref<1x4x16x16xf32, #tpu.memory_space<vmem>>, vector<1x1x16x16xf32>
    %210 = vector.shape_cast %209 : vector<1x1x16x16xf32> to vector<16x16xf32>
    %c8 = arith.constant 8 : index
    %211 = memref.load %arg2[%c8] : memref<36xf32, #tpu.memory_space<smem>>
    %212 = vector.broadcast %211 : f32 to vector<16x16xf32>
    %213 = arith.mulf %210, %212 : vector<16x16xf32>
    %c0_163 = arith.constant 0 : index
    %c1_164 = arith.constant 1 : index
    %c0_165 = arith.constant 0 : index
    %c0_166 = arith.constant 0 : index
    %214 = vector.load %arg1[%c0_163, %c1_164, %c0_165, %c0_166] : memref<1x4x16x16xf32, #tpu.memory_space<vmem>>, vector<1x1x16x16xf32>
    %215 = vector.shape_cast %214 : vector<1x1x16x16xf32> to vector<16x16xf32>
    %c17 = arith.constant 17 : index
    %216 = memref.load %arg2[%c17] : memref<36xf32, #tpu.memory_space<smem>>
    %217 = vector.broadcast %216 : f32 to vector<16x16xf32>
    %218 = arith.mulf %215, %217 : vector<16x16xf32>
    %219 = arith.addf %213, %218 : vector<16x16xf32>
    %c0_167 = arith.constant 0 : index
    %c2_168 = arith.constant 2 : index
    %c0_169 = arith.constant 0 : index
    %c0_170 = arith.constant 0 : index
    %220 = vector.load %arg1[%c0_167, %c2_168, %c0_169, %c0_170] : memref<1x4x16x16xf32, #tpu.memory_space<vmem>>, vector<1x1x16x16xf32>
    %221 = vector.shape_cast %220 : vector<1x1x16x16xf32> to vector<16x16xf32>
    %c26 = arith.constant 26 : index
    %222 = memref.load %arg2[%c26] : memref<36xf32, #tpu.memory_space<smem>>
    %223 = vector.broadcast %222 : f32 to vector<16x16xf32>
    %224 = arith.mulf %221, %223 : vector<16x16xf32>
    %225 = arith.addf %219, %224 : vector<16x16xf32>
    %c0_171 = arith.constant 0 : index
    %c3_172 = arith.constant 3 : index
    %c0_173 = arith.constant 0 : index
    %c0_174 = arith.constant 0 : index
    %226 = vector.load %arg1[%c0_171, %c3_172, %c0_173, %c0_174] : memref<1x4x16x16xf32, #tpu.memory_space<vmem>>, vector<1x1x16x16xf32>
    %227 = vector.shape_cast %226 : vector<1x1x16x16xf32> to vector<16x16xf32>
    %c35 = arith.constant 35 : index
    %228 = memref.load %arg2[%c35] : memref<36xf32, #tpu.memory_space<smem>>
    %229 = vector.broadcast %228 : f32 to vector<16x16xf32>
    %230 = arith.mulf %227, %229 : vector<16x16xf32>
    %231 = arith.addf %225, %230 : vector<16x16xf32>
    %c1_175 = arith.constant 1 : index
    %c1_176 = arith.constant 1 : index
    %232 = vector.load %arg7[%c1_175, %c1_176] : memref<18x18xf32, #tpu.memory_space<vmem>>, vector<16x16xf32>
    tpu.vector_store %arg7[%c1_175, %c1_176], %231 {strides = array<i32>} : memref<18x18xf32, #tpu.memory_space<vmem>>, vector<16x16xf32>,
    %c2_177 = arith.constant 2 : index
    %c2_178 = arith.constant 2 : index
    %233 = vector.load %arg7[%c2_177, %c2_178] : memref<18x18xf32, #tpu.memory_space<vmem>>, vector<16x16xf32>
    %234 = arith.addf %208, %233 : vector<16x16xf32>
    %c0_179 = arith.constant 0 : index
    %235 = memref.load %arg3[%c0_179] : memref<1xf32, #tpu.memory_space<smem>>
    %236 = vector.broadcast %235 : f32 to vector<16x16xf32>
    %237 = arith.addf %234, %236 : vector<16x16xf32>
    %238 = arith.negf %237 : vector<16x16xf32>
    %239 = math.exp %238 : vector<16x16xf32>
    %cst_180 = arith.constant 1.000000e+00 : f32
    %240 = vector.broadcast %cst_180 : f32 to vector<16x16xf32>
    %241 = arith.addf %240, %239 : vector<16x16xf32>
    %242 = arith.divf %240, %241 : vector<16x16xf32>
    %c0_181 = arith.constant 0 : index
    %c0_182 = arith.constant 0 : index
    %243 = vector.load %arg5[%c0_181, %c0_182] : memref<16x32xf32, #tpu.memory_space<vmem>>, vector<16x32xf32>
    %cst_183 = arith.constant dense<0.000000e+00> : vector<16x32xf32>
    %244 = tpu.matmul %242, %243, %cst_183 {dimension_numbers = #tpu.dot_dimension_numbers<[1], [0], [0], [1], [0, 0, 1, 1], [], []>} : vector<16x16xf32>, vector<16x32xf32>, vector<16x32xf32> -> vector<16x32xf32>
    %c0_184 = arith.constant 0 : index
    %c0_185 = arith.constant 0 : index
    %245 = vector.load %arg4[%c0_184, %c0_185] : memref<32x16xf32, #tpu.memory_space<vmem>>, vector<32x16xf32>
    %cst_186 = arith.constant dense<0.000000e+00> : vector<32x32xf32>
    %246 = tpu.matmul %245, %244, %cst_186 {dimension_numbers = #tpu.dot_dimension_numbers<[1], [0], [0], [1], [0, 0, 1, 1], [], []>} : vector<32x16xf32>, vector<16x32xf32>, vector<32x32xf32> -> vector<32x32xf32>
    %c0_187 = arith.constant 0 : index
    %c0_188 = arith.constant 0 : index
    %c0_189 = arith.constant 0 : index
    %247 = vector.load %arg6[%c0_187, %c0_188, %c0_189] : memref<1x32x32xf32, #tpu.memory_space<vmem>>, vector<1x32x32xf32>
    %248 = vector.shape_cast %247 : vector<1x32x32xf32> to vector<32x32xf32>
    %249 = vector.shape_cast %246 : vector<32x32xf32> to vector<1x32x32xf32>
    tpu.vector_store %arg6[%c0_187, %c0_188, %c0_189], %249 {strides = array<i32>} : memref<1x32x32xf32, #tpu.memory_space<vmem>>, vector<1x32x32xf32>,
    return
  }
  func.func @transform_0(%arg0: i32) -> (i32, i32, i32, i32) {
    %c0_i32 = arith.constant 0 : i32
    %c0_i32_0 = arith.constant 0 : i32
    %c0_i32_1 = arith.constant 0 : i32
    %c0_i32_2 = arith.constant 0 : i32
    return %arg0, %c0_i32, %c0_i32_0, %c0_i32_1 : i32, i32, i32, i32
  }
  func.func @transform_1(%arg0: i32) -> i32 {
    %c0_i32 = arith.constant 0 : i32
    %c0_i32_0 = arith.constant 0 : i32
    return %c0_i32 : i32
  }
  func.func @transform_2(%arg0: i32) -> i32 {
    %c0_i32 = arith.constant 0 : i32
    %c0_i32_0 = arith.constant 0 : i32
    return %c0_i32 : i32
  }
  func.func @transform_3(%arg0: i32) -> (i32, i32) {
    %c0_i32 = arith.constant 0 : i32
    %c0_i32_0 = arith.constant 0 : i32
    %c0_i32_1 = arith.constant 0 : i32
    return %c0_i32, %c0_i32_0 : i32, i32
  }
  func.func @transform_4(%arg0: i32) -> (i32, i32) {
    %c0_i32 = arith.constant 0 : i32
    %c0_i32_0 = arith.constant 0 : i32
    %c0_i32_1 = arith.constant 0 : i32
    return %c0_i32, %c0_i32_0 : i32, i32
  }
  func.func @transform_5(%arg0: i32) -> (i32, i32, i32) {
    %c0_i32 = arith.constant 0 : i32
    %c0_i32_0 = arith.constant 0 : i32
    %c0_i32_1 = arith.constant 0 : i32
    return %arg0, %c0_i32, %c0_i32_0 : i32, i32, i32
  }
}

</mosaic_0001>

<bundles_post_ra>
// kernel: tpu_custom_call.1
= control target key start
LH: loop header
LB: loop body
LE: loop exit
PB: predicated region body
PF: predicated region fallthrough
CT: control target
= control target key end

     0   :  { %s1815_s0 = inlined_call_operand.hbm [shape: f32[2,4,16,16], index: 0, kind: input, shape index: {}]   ;;  %s1816_s1 = inlined_call_operand.vmem [shape: f32[36], index: 1, kind: input, shape index: {}]   ;;  %s1817_s2 = inlined_call_operand.<no memory space> [shape: f32[1], index: 2, kind: input, shape index: {}]   ;;  %s1818_s3 = inlined_call_operand.vmem [shape: f32[32,16], index: 3, kind: input, shape index: {}]   ;;  %s1819_s4 = inlined_call_operand.vmem [shape: f32[16,32], index: 4, kind: input, shape index: {}]   ;;  %s1820_s5 = inlined_call_operand.hbm [shape: f32[2,32,32], index: 5, kind: output, shape index: {}]  }
   0x1   :  { %10 = sst [smem:[#allocation3]] %s1817_s2 }
   0x2   :  { %11 = vsyncpa [#allocation5], 0 }
   0x3   :  { %13 = vsyncpa [#allocation5 + $0x1], 0 }
   0x4   :  { %14 = vsyncpa [#allocation7], 0 }
   0x5   :  { %15 = vsyncpa [#allocation6], 0 }
   0x6   :  { %17 = vsyncpa [#allocation6 + $0x1], 0  ;;  %s1366_s20 = smov 0   ;;  %s1368_s21 = smov 0  }
   0x7   :  { %s1370_s22 = smov 0   ;;  %s1372_s23 = smov 0  }
   0x8 LB: > { %s1387_s2 = sadd.s32 4294967295, %s1320_s23   ;;  %s988_s24 = sadd.s32 4294967294, %s1320_s23   ;;  %s1320_s23 = sphi %s1372_s23, %s1840_s23   ;;  %s1316_s22 = sphi %s1370_s22, %s1839_s22   ;;  %s1312_s21 = sphi %s1368_s21, %s1838_s21   ;;  %s1308_s20 = sphi %s1366_s20, %s1837_s20  }
   0x9   : > { %s1391_s25 = sadd.s32 1, %s1320_s23   ;;  %s30_s26 = sadd.s32 1, %s1316_s22 }
   0xa   : > { %s27_s27 = ssub.s32 %s1320_s23, %s1391_s25  ;;  %p37_p0 = scmp.ne.s32.totalorder %s1316_s22, %s1312_s21 }
   0xb   : > { %p28_p1 = scmp.eq.s32.totalorder %s27_s27, 0  ;;  %p38_p2 = scmp.eq.s32.totalorder %s1320_s23, 0 }
   0xc   : > { %p43_p3 = scmp.ne.s32.totalorder %s1312_s21, %s1308_s20  ;;  %p1822_p4 = scmp.eq.s32.totalorder %s1387_s2, 0 }
   0xd   : > { %s1403_s28 = scalar_select %p28_p1, %s1316_s22, %s30_s26  }
   0xe   : > { %p1405_p5 = por %p38_p2, %p37_p0  ;;  %p1411_p6 = por %p1822_p4, %p43_p3 }
   0xf   : > { %p151_p7 = scmp.eq.s32.totalorder %s1387_s2, 1  ;;  %p157_p8 = scmp.eq.s32.totalorder %s988_s24, 1 }
  0x10   : > { %s1825_s30 = scalar_select %p1411_p6, 1, 0 }
  0x11   : > { %p989_p9 = scmp.ge.s32.totalorder %s1320_s23, 1  ;;  %p164_p10 = scmp.lt.s32.totalorder %s1320_s23, 3 }
  0x12   : > { %p1418_p11 = por %p151_p7, %p37_p0  ;;  %p1422_p12 = por %p157_p8, %p43_p3 }
  0x13   : > { %p1426_p13 = pnand %p989_p9, %p164_p10  ;;  %s177_s11 = sshll.u32 %s1816_s1, 4  ;;  %s178_s11 = int_to_ptr.vmem [resolvable:$true] %s177_s11 }
  0x14   : > { %s1826_s6 = scalar_select %p1418_p11, 1, 0 }
  0x15   : > { %s1827_s7 = scalar_select %p1422_p12, 1, 0 }
  0x16   : > { %p1140_p1 = pneg %p1426_p13  ;;  %p1153_p2 = scmp.lt.s32.totalorder %s1320_s23, 2 }
  0x17   : > { %s197_s13 = sand.u32 1, %s1316_s22   ;;  %s1205_s16 = scalar_lea.vmem %s178_s11, 16 }
  0x18   : > { %p1439_p7 = pnand %p1140_p1, %p1822_p4  ;;  %p1446_p3 = pnand %p1153_p2, %p1405_p5 }
  0x19   : > { %s992_s15 = sshll.u32 %s197_s13, 6  ;;  %p1206_p8 = scmp.ne.s32.totalorder %s178_s11, %s1205_s16 }
  0x1a   : > { %p1207_p9 = pneg %p1439_p7  ;;  %p1213_p12 = scmp.lt.s32.totalorder %s178_s11, %s178_s11 }
  0x1b   : > { %p1214_p11 = scmp.lt.s32.totalorder %s1205_s16, %s1205_s16 }
  0x1c   : > { %p1208_p10 = pnand %p1207_p9, %p1206_p8 }
  0x1d   : > { %p1215_p1 = por %p1214_p11, %p1213_p12 }
  0x1e   : > { %p1209_p0 = pneg %p1208_p10 }
  0x20   : > { %p1216_p4 = pnand %p1215_p1, %p1209_p0 }
  0x22   : > { %1219 = shalt.err (!%p1216_p4)
}
  0x23   : > { %s1322_s17 = smov [#allocation8]   ;;  %s1095_s18 = sshll.u32 %s1320_s23, 10 }
  0x24   : > { %1143 = dma.vmem_to_smem (!%p1439_p7), %s178_s11, 16, %s1322_s17, [#allocation7]  }
  0x25   : > { %s201_s19 = scalar_lea.vmem [#allocation4], %s992_s15  ;;  %s1458_s29 = scalar_lea.hbm %s1815_s0, %s1095_s18 }
  0x26   : > { %s208_s24 = sshll.u32 %s201_s19, 4  ;;  %s1462_s9 = scalar_lea.sflag [#allocation5], %s197_s13  ;;  %s1460_s24 = int_to_ptr.vmem [resolvable:$true] %s208_s24 }
  0x27   : > { %s1220_s10 = scalar_lea.hbm %s1458_s29, 1024  ;;  %p1222_p5 = pneg %p1446_p3 }
  0x28   : > { %p1221_p4 = scmp.ne.s32.totalorder %s1458_s29, %s1220_s10  ;;  %s1225_s15 = scalar_lea.hbm %s1815_s0, 2048 }
  0x29   : > { %p1226_p0 = scmp.lt.u32.totalorder %s1458_s29, %s1815_s0  ;;  %p1227_p2 = scmp.lt.u32.totalorder %s1225_s15, %s1220_s10 }
  0x2a   : > { %p1223_p11 = pnand %p1222_p5, %p1221_p4  ;;  %p1229_p8 = scmp.lt.u32.totalorder %s1220_s10, %s1458_s29 }
  0x2b   : > { %p1228_p7 = por %p1227_p2, %p1226_p0 }
  0x2c   : > { %p1224_p12 = pneg %p1223_p11 }
  0x2d   : > { %p1230_p9 = por %p1229_p8, %p1228_p7 }
  0x2f   : > { %p1231_p10 = pnand %p1230_p9, %p1224_p12 }
  0x31   : > { %1234 = shalt.err (!%p1231_p10)
}
  0x32   : > { %s1235_s13 = scalar_lea.vmem %s1460_s24, 1024  ;;  %s1323_s18 = smov [#allocation4]  }
  0x33   : > { %p1236_p1 = scmp.ne.s32.totalorder %s1460_s24, %s1235_s13  ;;  %s1240_s19 = sshll.u32 %s1323_s18, 4  ;;  %s1241_s19 = int_to_ptr.vmem [resolvable:$false] %s1240_s19 }
  0x34   : > { %s1242_s26 = scalar_lea.vmem %s1241_s19, 2048  ;;  %p1243_p6 = scmp.lt.s32.totalorder %s1460_s24, %s1241_s19 }
  0x35   : > { %p1238_p4 = pnand %p1236_p1, %p1222_p5  ;;  %p1244_p0 = scmp.lt.s32.totalorder %s1242_s26, %s1235_s13 }
  0x37   : > { %p1239_p11 = pneg %p1238_p4  ;;  %p1245_p2 = por %p1244_p0, %p1243_p6 }
  0x39   : > { %p1246_p7 = pnand %p1245_p2, %p1239_p11 }
  0x3b   : > { %1249 = shalt.err (!%p1246_p7)
}
  0x3c   : > { %s1324_s27 = smov 128   ;;  %s1325_s10 = smov 8  }
  0x3d   : > { %1147 = dma.hbm_to_vmem [thread:$0]  (!%p1446_p3), %s1458_s29, 1024, %s1460_s24, %s1462_s9, %s1324_s27, %s1324_s27, %s1325_s10  }
  0x3e   : > { %220 = sbr.rel (%p1426_p13) target bundleno = 873 (0x369), region = 40  ;;  %s1493_s11 = sand.u32 (!%p1426_p13), 1, %s1312_s21  }
  0x3f   : > { %s996_s12 = sshll.u32 (!%p1426_p13), %s1493_s11, 6  ;;  %s223_s15 = scalar_lea.sflag (!%p1426_p13), [#allocation5], %s1493_s11 }
  0x40   : > { %s226_s16 = scalar_lea.vmem (!%p1426_p13), [#allocation4], %s996_s12  ;;  %p1831_p6 = scmp.ne.s32.totalorder (!%p1426_p13), %s1825_s30, 0 }
  0x45   : > { %1295 = dma.done.wait (%p1831_p6), %s223_s15, 1024  }
  0x46   : > { %1297 = vsyncadd (%p1831_p6), %s223_s15, 4294966272  ;;  %p1832_p5 = scmp.eq.s32.totalorder %s1387_s2, 0 }
  0x48   : > { %1299 = dma.done.wait (%p1832_p5), [#allocation7], 16   ;;  %p1833_p3 = pmov %p1832_p5 }
  0x4a   : > { %1301 = vsyncadd (%p1833_p3), [#allocation7], 4294967280 }
  0x4b   : > { %235 = sfence }
  0x4c   : > { %s265_s8 = sld [smem:[#allocation8]]  ;;  %s1001_s14 = sld [smem:[#allocation8 + $0x9]]  ;;  %vm258_vm0 = vcmask 146432   ;;  %v1513_v0 = vld [vmem:[%s226_s16] sm:$0xff]  ;;  %v1515_v1 = vld [vmem:[%s226_s16 + $0x8] sm:$0xff]  ;;  %v1326_v2 = vmov 0.0  }
  0x4d   : > { %s1505_s24 = sld [smem:[#allocation8 + $0x12]]  ;;  %s1507_s29 = sld [smem:[#allocation8 + $0x1b]]  ;;  %259 = vst.msk [vmem:[#allocation2] sm:$0xff] %vm258_vm0, %v1326_v2  ;;  %260 = vst.msk [vmem:[#allocation2 + $0x8] sm:$0xff] %vm258_vm0, %v1326_v2  ;;  %v1521_v3 = vld [vmem:[%s226_s16 + $0x10] sm:$0xff]  ;;  %v1523_v4 = vld [vmem:[%s226_s16 + $0x18] sm:$0xff] }
  0x4e   : > { %s1509_s9 = sld [smem:[#allocation8 + $0x1]]  ;;  %s1511_s17 = sld [smem:[#allocation8 + $0xa]]  ;;  %v1525_v5 = vld [vmem:[%s226_s16 + $0x20] sm:$0xff]  ;;  %vm261_vm1 = vcmask 140288   ;;  %v1527_v7 = vld [vmem:[%s226_s16 + $0x28] sm:$0xff]  ;;  %v1529_v8 = vld [vmem:[%s226_s16 + $0x30] sm:$0xff] }
  0x4f   : > { %s1517_s30 = sld [smem:[#allocation8 + $0x13]]  ;;  %s1519_s13 = sld [smem:[#allocation8 + $0x1c]]  ;;  %v1531_v9 = vld [vmem:[%s226_s16 + $0x38] sm:$0xff]  ;;  %262 = vst.msk [vmem:[#allocation2 + $0x10] sm:$0x3] %vm261_vm1, %v1326_v2  ;;  %vm304_vm2 = vcmask 138248  }
  0x50   : > { %s1533_s18 = sld [smem:[#allocation8 + $0x2]]  ;;  %s1537_s19 = sld [smem:[#allocation8 + $0xb]]  ;;  %vm701_vm3 = vcmask 130048   ;;  %vm884_vm4 = vcmask 261120  }
  0x51   : > { %s1539_s26 = sld [smem:[#allocation8 + $0x14]]  ;;  %s1549_s27 = sld [smem:[#allocation8 + $0x1d]] }
  0x52   : > { %v266_v6 = vstv %s265_s8  ;;  %v273_v12 = vstv %s1001_s14  ;;  %s1557_s10 = sld [smem:[#allocation8 + $0x3]]  ;;  %s1559_s12 = sld [smem:[#allocation8 + $0xc]] }
  0x53   : > { %v267_v10 = vmul.f32 %v266_v6, %v1513_v0  ;;  %v268_v11 = vmul.f32 %v266_v6, %v1515_v1  ;;  %v274_v13 = vmul.f32 %v1521_v3, %v273_v12  ;;  %v275_v14 = vmul.f32 %v1523_v4, %v273_v12  ;;  %s1563_s15 = sld [smem:[#allocation8 + $0x15]]  ;;  %s1568_s16 = sld [smem:[#allocation8 + $0x1e]] }
  0x54   : > { %v282_v15 = vstv %s1505_s24  ;;  %v291_v16 = vstv %s1507_s29  ;;  %v314_v23 = vstv %s1509_s9  ;;  %v320_v24 = vstv %s1511_s17  ;;  %s1574_s8 = sld [smem:[#allocation8 + $0x5]]  ;;  %s1327_s14 = smov 1  }
  0x55   : > { %v283_v17 = vmul.f32 %v1525_v5, %v282_v15  ;;  %v284_v18 = vmul.f32 %v1527_v7, %v282_v15  ;;  %v292_v19 = vmul.f32 %v1529_v8, %v291_v16  ;;  %v293_v20 = vmul.f32 %v1531_v9, %v291_v16  ;;  %s1580_s24 = sld [smem:[#allocation8 + $0xe]]  ;;  %s1585_s29 = sld [smem:[#allocation8 + $0x17]] }
  0x56   : > { %v276_v21 = vadd.f32 %v274_v13, %v267_v10  ;;  %v277_v22 = vadd.f32 %v275_v14, %v268_v11  ;;  %v315_v25 = vmul.f32 %v314_v23, %v1513_v0  ;;  %v316_v26 = vmul.f32 %v314_v23, %v1515_v1  ;;  %s1587_s9 = sld [smem:[#allocation8 + $0x20]]  ;;  %s1595_s17 = sld [smem:[#allocation8 + $0x6]] }
  0x57   : > { %v321_v27 = vmul.f32 %v1521_v3, %v320_v24  ;;  %v322_v28 = vmul.f32 %v1523_v4, %v320_v24  ;;  %v328_v31 = vstv %s1517_s30  ;;  %v336_v32 = vstv %s1519_s13  ;;  %s1601_s30 = sld [smem:[#allocation8 + $0xf]]  ;;  %s1603_s13 = sld [smem:[#allocation8 + $0x18]] }
  0x58   : > { %v285_v29 = vadd.f32 %v283_v17, %v276_v21  ;;  %v286_v30 = vadd.f32 %v284_v18, %v277_v22  ;;  %v329_v34 = vmul.f32 %v1525_v5, %v328_v31  ;;  %v330_v35 = vmul.f32 %v1527_v7, %v328_v31  ;;  %p1834_p12 = scmp.ne.s32.totalorder %s1826_s6, 0 }
  0x59   : > { %v323_v33 = vadd.f32 %v321_v27, %v315_v25  ;;  %v337_v36 = vmul.f32 %v1529_v8, %v336_v32  ;;  %v338_v39 = vmul.f32 %v1531_v9, %v336_v32  ;;  %v324_v40 = vadd.f32 %v322_v28, %v316_v26 }
  0x5a   : > { %v294_v37 = vadd.f32 %v292_v19, %v285_v29  ;;  %v295_v38 = vadd.f32 %v293_v20, %v286_v30  ;;  %v366_v42 = vstv %s1533_s18  ;;  %v372_v43 = vstv %s1537_s19  ;;  %s1610_s18 = sld [smem:[#allocation8 + $0x21]]  ;;  %s1618_s19 = sld [smem:[#allocation8 + $0x7]] }
  0x5b   : > { %v331_v41 = vadd.f32 %v329_v34, %v323_v33  ;;  %v380_v44 = vstv %s1539_s26  ;;  %v332_v45 = vadd.f32 %v330_v35, %v324_v40  ;;  %v368_v46 = vmul.f32 %v366_v42, %v1515_v1  ;;  %s1625_s26 = sld [smem:[#allocation8 + $0x10]] }
  0x5c   : > { %298 = vrot.lane.b32.xlu0 %v294_v37, %s1327_s14  ;;  %v374_v47 = vmul.f32 %v1523_v4, %v372_v43  ;;  %v382_v48 = vmul.f32 %v1527_v7, %v380_v44  ;;  %v388_v50 = vstv %s1549_s27  ;;  %v367_v51 = vmul.f32 %v366_v42, %v1513_v0  ;;  %s1629_s27 = sld [smem:[#allocation8 + $0x19]] }
  0x5d   : > { %v339_v49 = vadd.f32 %v337_v36, %v331_v41  ;;  %v373_v52 = vmul.f32 %v1521_v3, %v372_v43  ;;  %v340_v53 = vadd.f32 %v338_v39, %v332_v45  ;;  %v390_v55 = vmul.f32 %v1531_v9, %v388_v50 }
  0x5e   : > { %v376_v54 = vadd.f32 %v374_v47, %v368_v46  ;;  %v381_v56 = vmul.f32 %v1525_v5, %v380_v44  ;;  %v389_v58 = vmul.f32 %v1529_v8, %v388_v50  ;;  %v418_v59 = vstv %s1557_s10  ;;  %s1631_s10 = sld [smem:[#allocation8 + $0x22]] }
  0x5f   : > { %343 = vrot.lane.b32.xlu1 %v339_v49, %s1327_s14  ;;  %v375_v57 = vadd.f32 %v373_v52, %v367_v51  ;;  %v424_v60 = vstv %s1559_s12  ;;  %v420_v62 = vmul.f32 %v418_v59, %v1515_v1  ;;  %v432_v2 = vstv %s1563_s15  ;;  %s1637_s12 = sld [smem:[#allocation8 + $0x8]]  ;;  %s1644_s15 = sld [smem:[#allocation8 + $0x11]] }
  0x60   : > { %300 = vrot.lane.b32.xlu0 %v295_v38, %s1327_s14  ;;  %v384_v61 = vadd.f32 %v382_v48, %v376_v54  ;;  %v426_v63 = vmul.f32 %v1523_v4, %v424_v60  ;;  %v434_v10 = vmul.f32 %v1527_v7, %v432_v2  ;;  %v440_v11 = vstv %s1568_s16  ;;  %s1651_s16 = sld [smem:[#allocation8 + $0x1a]] }
  0x61   : > { %v383_v6 = vadd.f32 %v381_v56, %v375_v57  ;;  %v419_v12 = vmul.f32 %v418_v59, %v1513_v0  ;;  %v442_v15 = vmul.f32 %v1531_v9, %v440_v11  ;;  %v425_v16 = vmul.f32 %v1521_v3, %v424_v60 }
  0x62   : > { %v392_v13 = vadd.f32 %v390_v55, %v384_v61  ;;  %v428_v14 = vadd.f32 %v426_v63, %v420_v62  ;;  %v433_v18 = vmul.f32 %v1525_v5, %v432_v2  ;;  %v441_v19 = vmul.f32 %v1529_v8, %v440_v11 }
  0x63   : > { %345 = vrot.lane.b32.xlu1 %v340_v53, %s1327_s14  ;;  %v391_v17 = vadd.f32 %v389_v58, %v383_v6  ;;  %v492_v20 = vstv %s1574_s8  ;;  %v427_v22 = vadd.f32 %v425_v16, %v419_v12  ;;  %v496_v24 = vstv %s1580_s24  ;;  %s1655_s8 = sld [smem:[#allocation8 + $0x23]]  ;;  %s1329_s24 = smov 126  }
  0x64   : > { %v436_v21 = vadd.f32 %v434_v10, %v428_v14  ;;  %v494_v23 = vmul.f32 %v492_v20, %v1515_v1  ;;  %v498_v25 = vmul.f32 %v1523_v4, %v496_v24  ;;  %v502_v26 = vstv %s1585_s29 }
  0x65   : > { %395 = vrot.lane.b32.xlu0 %v391_v17, %s1327_s14  ;;  %v508_v27 = vstv %s1587_s9  ;;  %v493_v28 = vmul.f32 %v492_v20, %v1513_v0  ;;  %v435_v30 = vadd.f32 %v433_v18, %v427_v22  ;;  %v504_v31 = vmul.f32 %v1527_v7, %v502_v26  ;;  %s998_s9 = sshll.u32 %s1493_s11, 5 }
  0x66   : > { %v444_v29 = vadd.f32 %v442_v15, %v436_v21  ;;  %v510_v32 = vmul.f32 %v1531_v9, %v508_v27  ;;  %v500_v33 = vadd.f32 %v498_v25, %v494_v23  ;;  %v497_v34 = vmul.f32 %v1521_v3, %v496_v24 }
  0x67   : > { %397 = vrot.lane.b32.xlu1 %v392_v13, %s1327_s14  ;;  %v503_v35 = vmul.f32 %v1525_v5, %v502_v26  ;;  %v509_v36 = vmul.f32 %v1529_v8, %v508_v27  ;;  %v443_v37 = vadd.f32 %v441_v19, %v435_v30  ;;  %v538_v38 = vstv %s1595_s17  ;;  %s257_s17 = scalar_lea.vmem [#allocation9], %s998_s9 }
  0x68   : > { %v544_v39 = vstv %s1601_s30  ;;  %v552_v40 = vstv %s1603_s13  ;;  %v506_v41 = vadd.f32 %v504_v31, %v500_v33  ;;  %v499_v42 = vadd.f32 %v497_v34, %v493_v28  ;;  %s1038_s13 = sld [smem:[#allocation8 + $0x4]]  ;;  %s903_s30 = sshll.u32 %s257_s17, 4  ;;  %s1766_s30 = int_to_ptr.vmem [resolvable:$true] %s903_s30 }
  0x69   : > { %v540_v43 = vmul.f32 %v538_v38, %v1515_v1  ;;  %v546_v44 = vmul.f32 %v1523_v4, %v544_v39  ;;  %447 = vrot.lane.b32.xlu0 %v443_v37, %s1327_s14  ;;  %v554_v45 = vmul.f32 %v1527_v7, %v552_v40  ;;  %v560_v46 = vstv %s1610_s18  ;;  %s1041_s18 = sld [smem:[#allocation8 + $0xd]] }
  0x6a   : > { %v539_v47 = vmul.f32 %v538_v38, %v1513_v0  ;;  %v545_v48 = vmul.f32 %v1521_v3, %v544_v39  ;;  %v512_v49 = vadd.f32 %v510_v32, %v506_v41  ;;  %v505_v50 = vadd.f32 %v503_v35, %v499_v42 }
  0x6b   : > { %449 = vrot.lane.b32.xlu1 %v444_v29, %s1327_s14  ;;  %v548_v51 = vadd.f32 %v546_v44, %v540_v43  ;;  %v562_v52 = vmul.f32 %v1531_v9, %v560_v46  ;;  %v553_v54 = vmul.f32 %v1525_v5, %v552_v40  ;;  %v561_v55 = vmul.f32 %v1529_v8, %v560_v46 }
  0x6c   : > { %v547_v53 = vadd.f32 %v545_v48, %v539_v47  ;;  %v582_v56 = vstv %s1618_s19  ;;  %v511_v57 = vadd.f32 %v509_v36, %v505_v50  ;;  %v588_v60 = vstv %s1625_s26  ;;  %s1044_s19 = sld [smem:[#allocation8 + $0x16]]  ;;  %s1047_s26 = sld [smem:[#allocation8 + $0x1f]] }
  0x6d   : > { %v556_v58 = vadd.f32 %v554_v45, %v548_v51  ;;  %v584_v59 = vmul.f32 %v582_v56, %v1515_v1  ;;  %v590_v62 = vmul.f32 %v1523_v4, %v588_v60  ;;  %v596_v63 = vstv %s1629_s27  ;;  %s683_s27 = sld [smem:[#allocation3]] }
  0x6e   : > { %v555_v61 = vadd.f32 %v553_v54, %v547_v53  ;;  %v604_v2 = vstv %s1631_s10  ;;  %515 = vrot.lane.b32.xlu0 %v511_v57, %s1327_s14  ;;  %v598_v10 = vmul.f32 %v1527_v7, %v596_v63  ;;  %v634_v12 = vstv %s1637_s12  ;;  %s1250_s10 = scalar_lea.vmem %s1766_s30, 512 }
  0x6f   : > { %517 = vrot.lane.b32.xlu1 %v512_v49, %s1327_s14  ;;  %v564_v6 = vadd.f32 %v562_v52, %v556_v58  ;;  %v606_v11 = vmul.f32 %v1531_v9, %v604_v2  ;;  %v592_v14 = vadd.f32 %v590_v62, %v584_v59  ;;  %v583_v15 = vmul.f32 %v582_v56, %v1513_v0  ;;  %p1251_p13 = scmp.ne.s32.totalorder %s1766_s30, %s1250_s10 }
  0x70   : > { %v563_v13 = vadd.f32 %v561_v55, %v555_v61  ;;  %v589_v16 = vmul.f32 %v1521_v3, %v588_v60  ;;  %v597_v17 = vmul.f32 %v1525_v5, %v596_v63  ;;  %v605_v18 = vmul.f32 %v1529_v8, %v604_v2 }
  0x71   : > { %v636_v19 = vmul.f32 %v634_v12, %v1515_v1  ;;  %v640_v20 = vstv %s1644_s15  ;;  %v600_v21 = vadd.f32 %v598_v10, %v592_v14  ;;  %v648_v24 = vstv %s1651_s16  ;;  %p1252_p8 = pnand %p1251_p13, %p1834_p12 }
  0x72   : > { %v591_v22 = vadd.f32 %v589_v16, %v583_v15  ;;  %v642_v23 = vmul.f32 %v1523_v4, %v640_v20  ;;  %567 = vrot.lane.b32.xlu0 %v563_v13, %s1327_s14  ;;  %v650_v25 = vmul.f32 %v1527_v7, %v648_v24  ;;  %v656_v26 = vstv %s1655_s8 }
  0x73   : > { %569 = vrot.lane.b32.xlu1 %v564_v6, %s1327_s14  ;;  %v635_v27 = vmul.f32 %v634_v12, %v1513_v0  ;;  %v641_v28 = vmul.f32 %v1521_v3, %v640_v20  ;;  %v608_v29 = vadd.f32 %v606_v11, %v600_v21  ;;  %v658_v32 = vmul.f32 %v1531_v9, %v656_v26  ;;  %p1253_p9 = pneg %p1252_p8 }
  0x74   : > { %v599_v30 = vadd.f32 %v597_v17, %v591_v22  ;;  %v644_v31 = vadd.f32 %v642_v23, %v636_v19  ;;  %v649_v34 = vmul.f32 %v1525_v5, %v648_v24  ;;  %v657_v35 = vmul.f32 %v1529_v8, %v656_v26  ;;  %v699_v17 = vld [vmem:[%s1819_s4] sm:$0xff] }
  0x75   : > { %v643_v33 = vadd.f32 %v641_v28, %v635_v27  ;;  %v462_v20 = vstv %s1038_s13  ;;  %v468_v21 = vstv %s1041_s18  ;;  %v476_v24 = vstv %s1044_s19  ;;  %s1096_s13 = sshll.u32 %s1387_s2, 9  ;;  %s1330_s2 = smov [#allocation9]  }
  0x76   : > { %v607_v36 = vadd.f32 %v605_v18, %v599_v30  ;;  %v652_v37 = vadd.f32 %v650_v25, %v644_v31  ;;  %v700_v18 = vld [vmem:[%s1819_s4 + $0x8] sm:$0xff]  ;;  %v464_v22 = vmul.f32 %v462_v20, %v1515_v1  ;;  %v470_v23 = vmul.f32 %v1523_v4, %v468_v21  ;;  %s1254_s12 = sshll.u32 %s1330_s2, 4  ;;  %s1255_s12 = int_to_ptr.vmem [resolvable:$false] %s1254_s12 }
  0x77   : > { %613 = vrot.lane.b32.xlu1 %v608_v29, %s1327_s14  ;;  %v651_v38 = vadd.f32 %v649_v34, %v643_v33  ;;  %v1124_v19 = vpack.c.bf16 %v700_v18, %v699_v17  ;;  %v463_v25 = vmul.f32 %v462_v20, %v1513_v0  ;;  %v469_v26 = vmul.f32 %v1521_v3, %v468_v21  ;;  %v786_v17 = vld [vmem:[%s1818_s3 + $0x18] sm:$0xff]  ;;  %s1256_s15 = scalar_lea.vmem %s1255_s12, 1024  ;;  %p1257_p10 = scmp.lt.s32.totalorder %s1766_s30, %s1255_s12 }
  0x78   : > { %611 = vrot.lane.b32.xlu0 %v607_v36, %s1327_s14  ;;  %v660_v39 = vadd.f32 %v658_v32, %v652_v37  ;;  %v472_v29 = vadd.f32 %v470_v23, %v464_v22  ;;  %v478_v30 = vmul.f32 %v1527_v7, %v476_v24  ;;  %v484_v31 = vstv %s1047_s26  ;;  %s1771_s26 = scalar_lea.hbm %s1820_s5, %s1096_s13  ;;  %p1258_p1 = scmp.lt.s32.totalorder %s1256_s15, %s1250_s10 }
  0x79   : > { %v659_v40 = vadd.f32 %v657_v35, %v651_v38  ;;  %1125 = vmatprep.subr.bf16.mxu0 %v1124_v19  ;;  %v471_v32 = vadd.f32 %v469_v26, %v463_v25  ;;  %v477_v33 = vmul.f32 %v1525_v5, %v476_v24  ;;  %v486_v0 = vmul.f32 %v1531_v9, %v484_v31 }
  0x7a   : > { %1127 = vmatpush3.bf16.msra.mxu0 %v1124_v19  ;;  %v480_v36 = vadd.f32 %v478_v30, %v472_v29  ;;  %p1259_p4 = por %p1258_p1, %p1257_p10 }
  0x7b   : > { %665 = vrot.lane.b32.xlu1 %v660_v39, %s1327_s14  ;;  %v479_v38 = vadd.f32 %v477_v33, %v471_v32  ;;  %v485_v39 = vmul.f32 %v1529_v8, %v484_v31 }
  0x7c   : > { %663 = vrot.lane.b32.xlu0 %v659_v40, %s1327_s14  ;;  %s1328_s14 = smov 127   ;;  %p1260_p11 = pnand %p1259_p4, %p1253_p9 }
  0x7d   : > { %v487_v5 = vadd.f32 %v485_v39, %v479_v38 }
  0xce   : > { %v299_v41 = vpop.permute.xlu0 %298 }
  0xcf   : > { %305 = vst.msk [vmem:[#allocation2 + $0x1] sm:$0xff] %vm304_vm2, %v299_v41  ;;  %v488_v41 = vadd.f32 %v486_v0, %v480_v36 }
  0xd1   : > { %v344_v43 = vpop.permute.xlu1 %343 }
  0xd2   : > { %v301_v42 = vpop.permute.xlu0 %300 }
  0xd3   : > { %306 = vst.msk [vmem:[#allocation2 + $0x9] sm:$0xff] %vm304_vm2, %v301_v42 }
  0xd5   : > { %v346_v44 = vpop.permute.xlu1 %345 }
  0xd6   : > { %v1695_v46 = vld [vmem:[#allocation2] sm:$0xff] }
  0xd7   : > { %v396_v48 = vpop.permute.xlu0 %395 }
  0xd9   : > { %v398_v47 = vpop.permute.xlu1 %397 }
  0xda   : > { %v1693_v45 = vld [vmem:[#allocation2 + $0x8] sm:$0xff] }
  0xdb   : > { %349 = vst.msk [vmem:[#allocation2 + $0x1] sm:$0xff] %vm304_vm2, %v344_v43  ;;  %350 = vst.msk [vmem:[#allocation2 + $0x9] sm:$0xff] %vm304_vm2, %v346_v44  ;;  %v448_v52 = vpop.permute.xlu0 %447 }
  0xdd   : > { %v450_v51 = vpop.permute.xlu1 %449 }
  0xe0   : > { %v516_v56 = vpop.permute.xlu0 %515 }
  0xe1   : > { %v518_v55 = vpop.permute.xlu1 %517 }
  0xe2   : > { %v352_v49 = vld [vmem:[#allocation2 + $0x8] sm:$0xff]  ;;  %v351_v50 = vld [vmem:[#allocation2] sm:$0xff] }
  0xe3   : > { %402 = vst.msk [vmem:[#allocation2 + $0x9] sm:$0xff] %vm304_vm2, %v398_v47  ;;  %401 = vst.msk [vmem:[#allocation2 + $0x1] sm:$0xff] %vm304_vm2, %v396_v48  ;;  %357 = vrot.lane.b32.xlu1 %v352_v49, %s1328_s14  ;;  %355 = vrot.lane.b32.xlu0 %v351_v50, %s1328_s14 }
  0xe4   : > { %v568_v60 = vpop.permute.xlu0 %567 }
  0xe5   : > { %v570_v59 = vpop.permute.xlu1 %569 }
  0xe9   : > { %v614_v63 = vpop.permute.xlu1 %613 }
  0xea   : > { %v404_v53 = vld [vmem:[#allocation2 + $0x8] sm:$0xff]  ;;  %v403_v54 = vld [vmem:[#allocation2] sm:$0xff]  ;;  %v612_v2 = vpop.permute.xlu0 %611 }
  0xeb   : > { %454 = vst.msk [vmem:[#allocation2 + $0x9] sm:$0xff] %vm304_vm2, %v450_v51  ;;  %409 = vrot.lane.b32.xlu1 %v404_v53, %s1329_s24  ;;  %407 = vrot.lane.b32.xlu0 %v403_v54, %s1329_s24  ;;  %453 = vst.msk [vmem:[#allocation2 + $0x1] sm:$0xff] %vm304_vm2, %v448_v52  ;;  %v684_v52 = vstv %s683_s27  ;;  %s890_s27 = scalar_lea.sflag [#allocation6], %s1493_s11 }
  0xed   : > { %v666_v11 = vpop.permute.xlu1 %665 }
  0xee   : > { %v664_v12 = vpop.permute.xlu0 %663 }
  0xf2   : > { %v1707_v57 = vld [vmem:[#allocation2 + $0x9] sm:$0xff]  ;;  %v1709_v58 = vld [vmem:[#allocation2 + $0x1] sm:$0xff] }
  0xf3   : > { %522 = vst.msk [vmem:[#allocation2 + $0x9] sm:$0xff] %vm304_vm2, %v518_v55  ;;  %521 = vst.msk [vmem:[#allocation2 + $0x1] sm:$0xff] %vm304_vm2, %v516_v56 }
  0xfa   : > { %v524_v61 = vld [vmem:[#allocation2 + $0x9] sm:$0xff]  ;;  %v523_v62 = vld [vmem:[#allocation2 + $0x1] sm:$0xff] }
  0xfb   : > { %529 = vrot.lane.b32.xlu1 %v524_v61, %s1329_s24  ;;  %574 = vst.msk [vmem:[#allocation2 + $0x9] sm:$0xff] %vm304_vm2, %v570_v59  ;;  %527 = vrot.lane.b32.xlu0 %v523_v62, %s1329_s24  ;;  %573 = vst.msk [vmem:[#allocation2 + $0x1] sm:$0xff] %vm304_vm2, %v568_v60 }
 0x102   : > { %v1717_v6 = vld [vmem:[#allocation2 + $0x2] sm:$0xff]  ;;  %v576_v10 = vld [vmem:[#allocation2 + $0xa] sm:$0xff] }
 0x103   : > { %618 = vst.msk [vmem:[#allocation2 + $0x9] sm:$0xff] %vm304_vm2, %v614_v63  ;;  %617 = vst.msk [vmem:[#allocation2 + $0x1] sm:$0xff] %vm304_vm2, %v612_v2 }
 0x10a   : > { %v620_v13 = vld [vmem:[#allocation2 + $0xa] sm:$0xff]  ;;  %v619_v14 = vld [vmem:[#allocation2 + $0x2] sm:$0xff] }
 0x10b   : > { %625 = vrot.lane.b32.xlu1 %v620_v13, %s1328_s14  ;;  %623 = vrot.lane.b32.xlu0 %v619_v14, %s1328_s14  ;;  %669 = vst.msk [vmem:[#allocation2 + $0x1] sm:$0xff] %vm304_vm2, %v664_v12  ;;  %670 = vst.msk [vmem:[#allocation2 + $0x9] sm:$0xff] %vm304_vm2, %v666_v11  ;;  %v783_v11 = vld [vmem:[%s1818_s3] sm:$0xff] }
 0x10c   : > { %1118 = vmatprep.mubr.msk.f32.mxu1 %vm701_vm3, %v783_v11 }
 0x112   : > { %v672_v15 = vld [vmem:[#allocation2 + $0xa] sm:$0xff]  ;;  %v671_v16 = vld [vmem:[#allocation2 + $0x2] sm:$0xff] }
 0x113   : > { %677 = vrot.lane.b32.xlu1 %v672_v15, %s1329_s24  ;;  %675 = vrot.lane.b32.xlu0 %v671_v16, %s1329_s24  ;;  %v784_v15 = vld [vmem:[%s1818_s3 + $0x8] sm:$0xff]  ;;  %v785_v16 = vld [vmem:[%s1818_s3 + $0x10] sm:$0xff] }
 0x155   : > { %v358_v27 = vpop.permute.xlu1 %357  ;;  %v356_v28 = vpop.permute.xlu0 %355 }
 0x156   : > { %v362_v1 = vadd.f32 %v358_v27, %v1693_v45  ;;  %v361_v4 = vadd.f32 %v356_v28, %v1695_v46 }
 0x15d   : > { %v410_v34 = vpop.permute.xlu1 %409  ;;  %v408_v35 = vpop.permute.xlu0 %407 }
 0x15e   : > { %v414_v37 = vadd.f32 %v410_v34, %v362_v1  ;;  %v413_v3 = vadd.f32 %v408_v35, %v361_v4 }
 0x160   : > { %v458_v7 = vadd.f32 %v1707_v57, %v414_v37  ;;  %v457_v40 = vadd.f32 %v1709_v58, %v413_v3 }
 0x162   : > { %v490_v44 = vadd.f32 %v488_v41, %v458_v7  ;;  %v489_v45 = vadd.f32 %v487_v5, %v457_v40 }
 0x16d   : > { %v530_v42 = vpop.permute.xlu1 %529  ;;  %v528_v43 = vpop.permute.xlu0 %527 }
 0x16e   : > { %v534_v46 = vadd.f32 %v530_v42, %v490_v44  ;;  %v533_v47 = vadd.f32 %v528_v43, %v489_v45 }
 0x170   : > { %v578_v49 = vadd.f32 %v576_v10, %v534_v46  ;;  %v577_v50 = vadd.f32 %v1717_v6, %v533_v47 }
 0x17d   : > { %v626_v48 = vpop.permute.xlu1 %625  ;;  %v624_v9 = vpop.permute.xlu0 %623 }
 0x17e   : > { %v630_v51 = vadd.f32 %v626_v48, %v578_v49  ;;  %v629_v8 = vadd.f32 %v624_v9, %v577_v50 }
 0x185   : > { %v678_v53 = vpop.permute.xlu1 %677  ;;  %v676_v54 = vpop.permute.xlu0 %675 }
 0x186   : > { %v682_v55 = vadd.f32 %v678_v53, %v630_v51  ;;  %v681_v56 = vadd.f32 %v676_v54, %v629_v8 }
 0x188   : > { %v686_v57 = vadd.f32 %v684_v52, %v682_v55  ;;  %v685_v58 = vadd.f32 %v684_v52, %v681_v56 }
 0x18a   : > { %v1083_v59 = vmul.f32 -1.442695, %v686_v57  ;;  %v1082_v60 = vmul.f32 -1.442695, %v685_v58 }
 0x18c   : > { %1197 = vpow2.f32 %v1083_v59 }
 0x18d   : > { %1199 = vpow2.f32 %v1082_v60 }
 0x196   : > { %v1198_v61 = vpop.eup %1197 }
 0x197   : > { %v1200_v62 = vpop.eup %1199  ;;  %v694_v63 = vadd.f32 1.0, %v1198_v61 }
 0x198   : > { %v693_v2 = vadd.f32 1.0, %v1200_v62 }
 0x199   : > { %1201 = vrcp.f32 %v694_v63 }
 0x19a   : > { %1203 = vrcp.f32 %v693_v2 }
 0x1a3   : > { %v1202_v6 = vpop.eup %1201 }
 0x1a4   : > { %v1204_v10 = vpop.eup %1203 }
 0x1a5   : > { %1111 = vmatprep.mubr.msk.f32.mxu0 %vm701_vm3, %v1204_v10 }
 0x1a6   : > { %1112 = vmatmul.mubr.msk.f32.vlgmr.msra.gmra.mrb[0].mxu0 %vm701_vm3, %v1202_v6 }
 0x279   : > { %v1113_v12 = vpop.f32.mrb[0].mxu0 }
 0x27a   : > { %v774_v13 = vpop.f32.mrb[1].mxu0 }
 0x27b   : > { %v1128_v14 = vpack.c.bf16 %v1113_v12, %v774_v13 }
 0x27d   : > { %1129 = vmatprep.subr.bf16.mxu1 %v1128_v14 }
 0x27e   : > { %1131 = vmatpush3.bf16.msra.mxu1 %v1128_v14 }
 0x281   : > { %1119 = vmatmul.mubr.msk.f32.vlgmr.msra.gmra.mrb[0].mxu1 %vm701_vm3, %v784_v15 }
 0x282   : > { %1121 = vmatprep.mubr.msk.f32.mxu1 %vm701_vm3, %v785_v16 }
 0x285   : > { %1122 = vmatmul.mubr.msk.f32.gmra.mrb[2].mxu1 %vm701_vm3, %v786_v17 }
 0x354   : > { %v1120_v18 = vpop.f32.mrb[0].mxu1 }
 0x355   : > { %886 = vst.msk [vmem:[%s257_s17 + $0x8] sm:$0xff] %vm884_vm4, %v1120_v18  ;;  %v865_v19 = vpop.f32.mrb[1].mxu1 }
 0x356   : > { %885 = vst.msk [vmem:[%s257_s17] sm:$0xff] %vm884_vm4, %v865_v19 }
 0x358   : > { %v1123_v20 = vpop.f32.mrb[2].mxu1 }
 0x359   : > { %888 = vst.msk [vmem:[%s257_s17 + $0x18] sm:$0xff] %vm884_vm4, %v1123_v20  ;;  %v875_v21 = vpop.f32.mrb[3].mxu1 }
 0x35a   : > { %887 = vst.msk [vmem:[%s257_s17 + $0x10] sm:$0xff] %vm884_vm4, %v875_v21 }
 0x35b   : > { %1263 = shalt.err (!%p1260_p11)
}
 0x35c   : > { %s1264_s16 = scalar_lea.hbm %s1771_s26, 512  ;;  %s1268_s24 = scalar_lea.hbm %s1820_s5, 1024 }
 0x35d   : > { %p1265_p0 = scmp.ne.s32.totalorder %s1771_s26, %s1264_s16  ;;  %p1269_p6 = scmp.lt.u32.totalorder %s1771_s26, %s1820_s5 }
 0x35e   : > { %p1270_p5 = scmp.lt.u32.totalorder %s1268_s24, %s1264_s16  ;;  %p1272_p13 = scmp.lt.u32.totalorder %s1264_s16, %s1771_s26 }
 0x35f   : > { %p1266_p2 = pnand %p1265_p0, %p1834_p12 }
 0x360   : > { %p1271_p3 = por %p1270_p5, %p1269_p6 }
 0x361   : > { %p1267_p7 = pneg %p1266_p2 }
 0x362   : > { %p1273_p8 = por %p1272_p13, %p1271_p3 }
 0x364   : > { %p1274_p9 = pnand %p1273_p8, %p1267_p7 }
 0x366   : > { %1277 = shalt.err (!%p1274_p9)
}
 0x367   : > { %s1331_s17 = smov 128   ;;  %s1332_s13 = smov 8  }
 0x368   : > { %1138 = dma.vmem_to_hbm [thread:$0]  (%p1834_p12), %s1766_s30, 512, %s1771_s26, %s890_s27, %s1331_s17, %s1331_s17, %s1332_s13  }
 0x369 PF: > { %s918_s18 = sand.u32 1, %s1308_s20   ;;  %p1835_p10 = scmp.ne.s32.totalorder %s1827_s7, 0 }
 0x36a   : > { %p1836_p1 = scmp.ge.s32.totalorder %s1320_s23, 2  ;;  %s919_s19 = scalar_lea.sflag [#allocation6], %s918_s18 }
 0x36c   : > { %p1149_p4 = pnand %p1836_p1, %p1835_p10 }
 0x36e   : > { %1303 = dma.done.wait (!%p1149_p4), %s919_s19, 512  }
 0x36f   : > { %1305 = vsyncadd (!%p1149_p4), %s919_s19, 4294966784  ;;  %p20_p11 = scmp.ge.s32.totalorder %s1391_s25, 4   ;;  %s1837_s20 = smov %s1312_s21 }
 0x370   : > { %s1838_s21 = smov %s1316_s22  ;;  %s1839_s22 = smov %s1403_s28 }
 0x371   : > { %s1840_s23 = smov %s1391_s25  ;;  %22 = sbr.rel (!%p20_p11) target bundleno = 8 (0x8), region = 93 }
 0x378   :  { %924 = vsyncpa [#allocation5], 1 }
 0x379   :  { %926 = vsyncpa [#allocation5 + $0x1], 1 }
 0x37a   :  { %927 = vsyncpa [#allocation6], 1 }
 0x37b   :  { %929 = vsyncpa [#allocation6 + $0x1], 1 }
 0x37c   :  { %930 = vsyncpa [#allocation7], 1 }
 0x37d   :  { %932 = vsyncpa [#allocation7 + $0x1], 1 }

</bundles_post_ra>
